<compile_context>
chip_gen: v6e
topology: v6e:2x2x1
jax: 0.10.0
libtpu: 0.0.40
codegen_flags: <defaults>
</compile_context>

<pallas_src>
import jax
import jax.numpy as jnp
from jax.experimental import pallas as pl
from jax.experimental.pallas import tpu as pltpu


def _identity_kernel(x_ref, o_ref):
    # Pure elementwise pass-through on the current VMEM tile.
    o_ref[...] = x_ref[...]


_LANE = 128
# ~2 MiB per block: big enough to sit at the HBM roofline (>=85% measured for
# >=512-wide tiles), small enough that double-buffered input + output
# (4 block buffers, ~8 MiB) fits v5e's 16 MiB scoped-VMEM default and
# v6e/v7x's 32 MiB default with headroom.
_TARGET_BLOCK_BYTES = 2 * 1024 * 1024
# Ragged arrays at or below this size go through a single full-extent block.
_SMALL_RAGGED_BYTES = 4 * 1024 * 1024


def _pick_cols(n):
    """Largest lane-dense width (multiple of 128, <=4096) that divides n exactly."""
    for cols in (4096, 2048, 1024, 512, 256, 128):
        if n % cols == 0:
            return cols
    return None


def _sublane_multiple(itemsize):
    """Sublane granularity accounting for sub-32-bit packing (8/16/32 rows)."""
    return 8 * max(1, 4 // itemsize)


def _run_identity(x2d, tile_rows, tile_cols, grid):
    rows, cols = x2d.shape
    return pl.pallas_call(
        _identity_kernel,
        out_shape=jax.ShapeDtypeStruct((rows, cols), x2d.dtype),
        grid_spec=pltpu.PrefetchScalarGridSpec(
            num_scalar_prefetch=0,
            grid=grid,
            in_specs=[pl.BlockSpec((tile_rows, tile_cols), lambda i: (i, 0))],
            out_specs=pl.BlockSpec((tile_rows, tile_cols), lambda i: (i, 0)),
        ),
        compiler_params=pltpu.CompilerParams(
            dimension_semantics=("parallel",),
        ),
        # Identity: let the output reuse the (reshaped) input buffer.
        input_output_aliases={0: 0},
    )(x2d)


def _run_identity_cols(x2d, tile_cols, grid):
    """Ragged path: array is (1, n), tile along the lane axis only."""
    rows, cols = x2d.shape
    return pl.pallas_call(
        _identity_kernel,
        out_shape=jax.ShapeDtypeStruct((rows, cols), x2d.dtype),
        grid_spec=pltpu.PrefetchScalarGridSpec(
            num_scalar_prefetch=0,
            grid=grid,
            in_specs=[pl.BlockSpec((1, tile_cols), lambda i: (0, i))],
            out_specs=pl.BlockSpec((1, tile_cols), lambda i: (0, i)),
        ),
        compiler_params=pltpu.CompilerParams(
            dimension_semantics=("parallel",),
        ),
        input_output_aliases={0: 0},
    )(x2d)


@jax.jit
def identity(x):
    """Pallas TPU implementation of Identity.forward: returns x unchanged."""
    orig_shape = x.shape
    orig_dtype = x.dtype
    n = x.size
    if n == 0:
        return x

    itemsize = jnp.dtype(orig_dtype).itemsize
    sub = _sublane_multiple(itemsize)
    cols = _pick_cols(n)

    if cols is not None:
        # Fast path: metadata-only reshape, no padding, lane-dense last dim.
        rows = n // cols
        x2d = x.reshape(rows, cols)
        # Block rows: ~_TARGET_BLOCK_BYTES per block, multiple of the packed
        # sublane count, or the full row extent for small arrays.
        tile_rows = max(sub, (_TARGET_BLOCK_BYTES // (cols * itemsize)) // sub * sub)
        if tile_rows >= rows:
            tile_rows = rows  # single full-extent block (always a legal shape)
        grid = (pl.cdiv(rows, tile_rows),)
        out2d = _run_identity(x2d, tile_rows, cols, grid)
    else:
        # Ragged fallback (n not a multiple of 128): keep a (1, n) view.
        x2d = x.reshape(1, n)
        if n * itemsize <= _SMALL_RAGGED_BYTES:
            # Small: one full-extent block, no padding, single grid step.
            out2d = _run_identity(x2d, 1, n, (1,))
        else:
            # Large ragged: tile along the lane axis with ~2 MiB lane-dense
            # blocks; the final (partial) block is handled by Pallas' implicit
            # boundary masking, so no host-side pad/slice copies are needed.
            tile_cols = max(_LANE, (_TARGET_BLOCK_BYTES // itemsize) // _LANE * _LANE)
            grid = (pl.cdiv(n, tile_cols),)
            out2d = _run_identity_cols(x2d, tile_cols, grid)

    return out2d.reshape(orig_shape)


if __name__ == "__main__":
    key = jax.random.PRNGKey(0)
    x = jax.random.normal(key, (2, 4, 16, 16), dtype=jnp.float32)  # NCHW
    y = identity(x)
    jax.block_until_ready(y)
    assert y.shape == x.shape and y.dtype == x.dtype
    assert bool(jnp.all(y == x))
    print("KERNEL_OK")
</pallas_src>

<mosaic_0001>
module attributes {stable_mosaic.version = 11 : i64} {
  func.func @_identity_kernel(%arg0: i32, %arg1: memref<1x2048xf32, #tpu.memory_space<vmem>>, %arg2: memref<1x2048xf32, #tpu.memory_space<vmem>>) attributes {dimension_semantics = [#tpu.dimension_semantics<parallel>], iteration_bounds = array<i64: 1>, scalar_prefetch = 0 : i64, scratch_operands = 0 : i64, tpu.core_type = #tpu.core_type<tc>, window_params = [{transform_indices = @transform_0, window_bounds = array<i64: 1, 2048>}, {transform_indices = @transform_1, window_bounds = array<i64: 1, 2048>}]} {
    %c0 = arith.constant 0 : index
    %c0_0 = arith.constant 0 : index
    %0 = vector.load %arg1[%c0, %c0_0] : memref<1x2048xf32, #tpu.memory_space<vmem>>, vector<1x2048xf32>
    %c0_1 = arith.constant 0 : index
    %c0_2 = arith.constant 0 : index
    %1 = vector.load %arg2[%c0_1, %c0_2] : memref<1x2048xf32, #tpu.memory_space<vmem>>, vector<1x2048xf32>
    tpu.vector_store %arg2[%c0_1, %c0_2], %0 {strides = array<i32>} : memref<1x2048xf32, #tpu.memory_space<vmem>>, vector<1x2048xf32>,
    return
  }
  func.func @transform_0(%arg0: i32) -> (i32, i32) {
    %c0_i32 = arith.constant 0 : i32
    %c0_i32_0 = arith.constant 0 : i32
    return %arg0, %c0_i32 : i32, i32
  }
  func.func @transform_1(%arg0: i32) -> (i32, i32) {
    %c0_i32 = arith.constant 0 : i32
    %c0_i32_0 = arith.constant 0 : i32
    return %arg0, %c0_i32 : i32, i32
  }
}

</mosaic_0001>

<bundles_post_ra>
// kernel: identity.1
= control target key start
LH: loop header
LB: loop body
LE: loop exit
PB: predicated region body
PF: predicated region fallthrough
CT: control target
= control target key end

     0   :  { %s38_s0 = inlined_call_operand.vmem [shape: f32[1,2048], index: 0, kind: input, shape index: {}, may-alias: {0,1}]   ;;  %s39_s1 = inlined_call_operand.vmem [shape: f32[1,2048], index: 1, kind: output, shape index: {}, may-alias: {0,1}]  }
   0x1   :  { %v8_v0 = vld [vmem:[%s38_s0] sm:$0xff]  ;;  %v9_v1 = vld [vmem:[%s38_s0 + $0x8] sm:$0xff] }
   0x2   :  { %10 = vst [vmem:[%s39_s1] sm:$0xff] %v8_v0  ;;  %11 = vst [vmem:[%s39_s1 + $0x8] sm:$0xff] %v9_v1 }

</bundles_post_ra>
